<compile_context>
chip_gen: v5e
topology: v5e:2x2
jax: 0.10.0
libtpu: 0.0.40
codegen_flags: <defaults>
</compile_context>

<pallas_src>
import functools

import jax
import jax.numpy as jnp
from jax.experimental import pallas as pl
from jax.experimental.pallas import tpu as pltpu


def _layernorm_kernel(x_ref, w_ref, b_ref, o_ref, *, eps):
    # x_ref block: (1, C, bl) -> work on the (C, bl) slab.
    xv = x_ref[0].astype(jnp.float32)                     # (C, bl)
    mean = jnp.mean(xv, axis=0, keepdims=True)            # (1, bl), cross-sublane (XLU)
    d = xv - mean
    var = jnp.mean(d * d, axis=0, keepdims=True)          # two-pass biased variance
    inv = jax.lax.rsqrt(var + eps)                        # EUP slot, frees the VALU
    o_ref[0] = (w_ref[...] * (d * inv) + b_ref[...]).astype(o_ref.dtype)


def _pick_block_l(L, C, itemsize, N,
                  target_block_bytes=4 * 1024 * 1024,
                  min_total_steps=8):
    """Byte-targeted lane tile, accounting for sublane padding of small C."""
    sub = max(1, 32 // itemsize)          # f32 -> 8 sublanes, bf16 -> 16, ...
    padded_c = -(-C // sub) * sub
    bytes_per_col = padded_c * itemsize

    bl = max(128, (target_block_bytes // bytes_per_col) // 128 * 128)
    bl = min(bl, -(-L // 128) * 128)      # never larger than padded L

    # Keep enough grid steps for prefetch/writeback overlap and megacore sharding.
    steps = N * (-(-L // bl))
    while steps < min_total_steps and bl > 128:
        new_bl = max(128, (bl // 2) // 128 * 128)
        if new_bl == bl:
            break
        bl = new_bl
        steps = N * (-(-L // bl))
    return bl


def layer_norm_nchw(x, weight, bias, *, eps=1e-6):
    """Channel-first LayerNorm. x:(N,C,H,W), weight/bias:(C,). Returns (N,C,H,W)."""
    N, C, H, W = x.shape
    L = H * W

    bl = _pick_block_l(L, C, jnp.dtype(x.dtype).itemsize, N)
    L_pad = pl.cdiv(L, bl) * bl
    grid = (N, L_pad // bl)

    x2 = x.reshape(N, C, L)               # contiguous reshape, outside the kernel
    if L_pad != L:
        # Zero-padded tail lanes compute finite junk (0/sqrt(eps)) and are
        # sliced off below; every store stays lane-dense / unmasked.
        x2 = jnp.pad(x2, ((0, 0), (0, 0), (0, L_pad - L)))
    w2 = weight.astype(jnp.float32).reshape(C, 1)   # pre-cast: no per-step casts
    b2 = bias.astype(jnp.float32).reshape(C, 1)

    out = pl.pallas_call(
        functools.partial(_layernorm_kernel, eps=eps),
        out_shape=jax.ShapeDtypeStruct((N, C, L_pad), x.dtype),
        grid=grid,
        in_specs=[
            pl.BlockSpec((1, C, bl), lambda n, l: (n, 0, l)),
            pl.BlockSpec((C, 1), lambda n, l: (0, 0)),   # resident across steps
            pl.BlockSpec((C, 1), lambda n, l: (0, 0)),
        ],
        out_specs=pl.BlockSpec((1, C, bl), lambda n, l: (n, 0, l)),
        compiler_params=pltpu.CompilerParams(
            dimension_semantics=("parallel", "parallel"),
            vmem_limit_bytes=48 * 1024 * 1024,
        ),
    )(x2, w2, b2)

    if L_pad != L:
        out = out[:, :, :L]
    return out.reshape(N, C, H, W)


def layer_norm_ref(x, weight, bias, eps=1e-6):
    """Pure-JAX reference matching the PyTorch module."""
    u = jnp.mean(x, axis=1, keepdims=True)
    s = jnp.mean((x - u) ** 2, axis=1, keepdims=True)
    y = (x - u) / jnp.sqrt(s + eps)
    return weight[None, :, None, None] * y + bias[None, :, None, None]


if __name__ == "__main__":
    key = jax.random.PRNGKey(0)
    kx, kw, kb, kx2 = jax.random.split(key, 4)

    # Primary small test: N=2, C=4, H=W=16 (L = 256, multiple of 128).
    N, C, H, W = 2, 4, 16, 16
    x = jax.random.normal(kx, (N, C, H, W), jnp.float32)
    weight = 1.0 + 0.1 * jax.random.normal(kw, (C,), jnp.float32)
    bias = 0.1 * jax.random.normal(kb, (C,), jnp.float32)

    fwd = jax.jit(layer_norm_nchw)
    out = fwd(x, weight, bias)
    jax.block_until_ready(out)

    ref = layer_norm_ref(x, weight, bias)
    assert out.shape == x.shape and out.dtype == x.dtype, (out.shape, out.dtype)
    assert bool(jnp.all(jnp.isfinite(out)))
    assert bool(jnp.allclose(out, ref, rtol=1e-5, atol=1e-5)), float(
        jnp.max(jnp.abs(out - ref)))

    # Secondary test: spatial size NOT a multiple of 128 (exercises padding path).
    Hb, Wb = 7, 9
    xb = jax.random.normal(kx2, (N, C, Hb, Wb), jnp.float32)
    outb = jax.jit(layer_norm_nchw)(xb, weight, bias)
    jax.block_until_ready(outb)
    refb = layer_norm_ref(xb, weight, bias)
    assert outb.shape == xb.shape and outb.dtype == xb.dtype
    assert bool(jnp.all(jnp.isfinite(outb)))
    assert bool(jnp.allclose(outb, refb, rtol=1e-5, atol=1e-5)), float(
        jnp.max(jnp.abs(outb - refb)))

    print("KERNEL_OK")
</pallas_src>

<mosaic_0001>
module attributes {stable_mosaic.version = 11 : i64} {
  func.func @_layernorm_kernel(%arg0: i32, %arg1: i32, %arg2: memref<1x4x128xf32, #tpu.memory_space<vmem>>, %arg3: memref<4x1xf32, #tpu.memory_space<vmem>>, %arg4: memref<4x1xf32, #tpu.memory_space<vmem>>, %arg5: memref<1x4x128xf32, #tpu.memory_space<vmem>>) attributes {dimension_semantics = [#tpu.dimension_semantics<parallel>, #tpu.dimension_semantics<parallel>], iteration_bounds = array<i64: 2, 2>, scalar_prefetch = 0 : i64, scratch_operands = 0 : i64, tpu.core_type = #tpu.core_type<tc>, window_params = [{transform_indices = @transform_0, window_bounds = array<i64: 1, 4, 128>}, {pipeline_mode = #tpu.pipeline_mode<synchronous>, transform_indices = @transform_1, window_bounds = array<i64: 4, 1>}, {pipeline_mode = #tpu.pipeline_mode<synchronous>, transform_indices = @transform_2, window_bounds = array<i64: 4, 1>}, {transform_indices = @transform_3, window_bounds = array<i64: 1, 4, 128>}]} {
    %c0 = arith.constant 0 : index
    %c0_0 = arith.constant 0 : index
    %c0_1 = arith.constant 0 : index
    %0 = vector.load %arg2[%c0, %c0_0, %c0_1] : memref<1x4x128xf32, #tpu.memory_space<vmem>>, vector<1x4x128xf32>
    %1 = vector.shape_cast %0 : vector<1x4x128xf32> to vector<4x128xf32>
    %cst = arith.constant dense<0.000000e+00> : vector<128xf32>
    %2 = vector.multi_reduction <add>, %1, %cst [0] : vector<4x128xf32> to vector<128xf32>
    %3 = vector.shape_cast %2 : vector<128xf32> to vector<1x128xf32>
    %cst_2 = arith.constant 4.000000e+00 : f32
    %4 = vector.broadcast %cst_2 : f32 to vector<1x128xf32>
    %5 = arith.divf %3, %4 : vector<1x128xf32>
    %6 = vector.broadcast %5 : vector<1x128xf32> to vector<4x128xf32>
    %7 = arith.subf %1, %6 : vector<4x128xf32>
    %8 = arith.mulf %7, %7 : vector<4x128xf32>
    %cst_3 = arith.constant dense<0.000000e+00> : vector<128xf32>
    %9 = vector.multi_reduction <add>, %8, %cst_3 [0] : vector<4x128xf32> to vector<128xf32>
    %10 = vector.shape_cast %9 : vector<128xf32> to vector<1x128xf32>
    %cst_4 = arith.constant 4.000000e+00 : f32
    %11 = vector.broadcast %cst_4 : f32 to vector<1x128xf32>
    %12 = arith.divf %10, %11 : vector<1x128xf32>
    %cst_5 = arith.constant 9.99999997E-7 : f32
    %13 = vector.broadcast %cst_5 : f32 to vector<1x128xf32>
    %14 = arith.addf %12, %13 : vector<1x128xf32>
    %15 = math.rsqrt %14 : vector<1x128xf32>
    %c0_6 = arith.constant 0 : index
    %c0_7 = arith.constant 0 : index
    %16 = vector.load %arg3[%c0_6, %c0_7] : memref<4x1xf32, #tpu.memory_space<vmem>>, vector<4x1xf32>
    %17 = vector.broadcast %15 : vector<1x128xf32> to vector<4x128xf32>
    %18 = arith.mulf %7, %17 : vector<4x128xf32>
    %19 = vector.broadcast %16 : vector<4x1xf32> to vector<4x128xf32>
    %20 = arith.mulf %19, %18 : vector<4x128xf32>
    %c0_8 = arith.constant 0 : index
    %c0_9 = arith.constant 0 : index
    %21 = vector.load %arg4[%c0_8, %c0_9] : memref<4x1xf32, #tpu.memory_space<vmem>>, vector<4x1xf32>
    %22 = vector.broadcast %21 : vector<4x1xf32> to vector<4x128xf32>
    %23 = arith.addf %20, %22 : vector<4x128xf32>
    %c0_10 = arith.constant 0 : index
    %c0_11 = arith.constant 0 : index
    %c0_12 = arith.constant 0 : index
    %24 = vector.load %arg5[%c0_10, %c0_11, %c0_12] : memref<1x4x128xf32, #tpu.memory_space<vmem>>, vector<1x4x128xf32>
    %25 = vector.shape_cast %24 : vector<1x4x128xf32> to vector<4x128xf32>
    %26 = vector.shape_cast %23 : vector<4x128xf32> to vector<1x4x128xf32>
    tpu.vector_store %arg5[%c0_10, %c0_11, %c0_12], %26 {strides = array<i32>} : memref<1x4x128xf32, #tpu.memory_space<vmem>>, vector<1x4x128xf32>,
    return
  }
  func.func @transform_0(%arg0: i32, %arg1: i32) -> (i32, i32, i32) {
    %c0_i32 = arith.constant 0 : i32
    %c0_i32_0 = arith.constant 0 : i32
    return %arg0, %c0_i32, %arg1 : i32, i32, i32
  }
  func.func @transform_1(%arg0: i32, %arg1: i32) -> (i32, i32) {
    %c0_i32 = arith.constant 0 : i32
    %c0_i32_0 = arith.constant 0 : i32
    %c0_i32_1 = arith.constant 0 : i32
    return %c0_i32, %c0_i32_0 : i32, i32
  }
  func.func @transform_2(%arg0: i32, %arg1: i32) -> (i32, i32) {
    %c0_i32 = arith.constant 0 : i32
    %c0_i32_0 = arith.constant 0 : i32
    %c0_i32_1 = arith.constant 0 : i32
    return %c0_i32, %c0_i32_0 : i32, i32
  }
  func.func @transform_3(%arg0: i32, %arg1: i32) -> (i32, i32, i32) {
    %c0_i32 = arith.constant 0 : i32
    %c0_i32_0 = arith.constant 0 : i32
    return %arg0, %c0_i32, %arg1 : i32, i32, i32
  }
}

</mosaic_0001>

<bundles_post_ra>
// kernel: layer_norm_nchw.1
= control target key start
LH: loop header
LB: loop body
LE: loop exit
PB: predicated region body
PF: predicated region fallthrough
CT: control target
= control target key end

     0   :  { %s462_s12 = smov 0   ;;  %s464_s13 = smov 0   ;;  %s528_s0 = inlined_call_operand.vmem [shape: f32[2,4,256], index: 0, kind: input, shape index: {}]   ;;  %s529_s1 = inlined_call_operand.vmem [shape: f32[4,1], index: 1, kind: input, shape index: {}]   ;;  %s530_s2 = inlined_call_operand.vmem [shape: f32[4,1], index: 2, kind: input, shape index: {}]   ;;  %s531_s3 = inlined_call_operand.vmem [shape: f32[2,4,256], index: 3, kind: output, shape index: {}]  }
   0x1   :  { %s466_s14 = smov 0   ;;  %s468_s15 = smov 0  }
   0x2   :  { %s470_s16 = smov 0  }
   0x3 LB: > { %s22_s17 = sadd.s32 1, %s430_s14  ;;  %s25_s18 = sadd.s32 1, %s434_s15  ;;  %s438_s16 = sphi %s470_s16, %s13_s16   ;;  %s434_s15 = sphi %s468_s15, %s535_s15   ;;  %s430_s14 = sphi %s466_s14, %s534_s14   ;;  %s426_s13 = sphi %s464_s13, %s533_s13   ;;  %s422_s12 = sphi %s462_s12, %s532_s12  }
   0x4   : > { %p23_p0 = scmp.ge.s32.totalorder %s22_s17, 2  ;;  %p346_p1 = scmp.ge.s32.totalorder %s438_s16, 1 }
   0x5   : > { %p156_p2 = scmp.lt.s32.totalorder %s438_s16, 5 }
   0x6   : > { %s537_s17 = smov (%p23_p0, %s22_s17), 0  ;;  %s539_s18 = smov (!%p23_p0, %s25_s18), %s434_s15 }
   0x7   : > { %p157_p3 = pnand %p346_p1, %p156_p2  ;;  %p27_p4 = scmp.ge.s32.totalorder %s539_s18, 2 }
   0x8   : > { %p186_p5 = scmp.lt.s32.totalorder (!%p157_p3), %s426_s13, 1  ;;  %p188_p6 = scmp.lt.s32.totalorder (!%p157_p3), %s422_s12, 1 }
   0x9   : > { %s541_s18 = smov (%p27_p4, %s539_s18), 0  ;;  %160 = sbr.rel (%p157_p3) target bundleno = 142 (0x8e), region = 32 }
   0xe   : > { %v240_v0 = vld [vmem:[%s529_s1] sm:$0xf]  ;;  %v440_v1 = vmov 0   ;;  %s543_s13 = smov (!%p186_p5, %s426_s13), 1  ;;  %s545_s12 = smov (!%p188_p6, %s422_s12), 1  ;;  %v441_v3 = vmov 4.0  }
   0xf   : > { %395 = vset.pattern.permute.xlu0 %v440_v1  ;;  %v248_v2 = vld [vmem:[%s530_s2] sm:$0xf]  ;;  %s347_s23 = sshll.u32 %s543_s13, 1  ;;  %396 = vrcp.f32 %v441_v3  ;;  %vm203_vm0 = vcmask 1043456  }
  0x10   : > { %244 = vperm.xlu0 %395, %v240_v0   ;;  %s498_s24 = sadd.s32 %s347_s23, %s545_s12 }
  0x11   : > { %s348_s25 = sshll.u32 %s498_s24, 2 }
  0x12   : > { %s193_s28 = scalar_lea.vmem %s528_s0, %s348_s25  ;;  %s201_s4 = scalar_lea.vmem %s531_s3, %s348_s25 }
  0x13   : > { %v202_v4 = vld [vmem:[%s193_s28] sm:$0xf] }
  0x14   : > { %v204_v5 = vsel %vm203_vm0, %v202_v4, 0.0 }
  0x15   : > { %v205_v6 = vrot.slane %v204_v5, 4  ;;  %v397_v7 = vpop.eup %396 }
  0x16   : > { %v212_v9 = vmul.f32 4.0, %v397_v7  ;;  %vm216_vm1 = vweird.f32 %v397_v7 }
  0x17   : > { %v206_v8 = vadd.f32 %v205_v6, %v204_v5 }
  0x18   : > { %251 = vperm.xlu0 %395, %v248_v2   ;;  %v213_v11 = vsub.f32 1.0, %v212_v9 }
  0x19   : > { %v207_v10 = vrot.slane %v206_v8, 2 }
  0x1a   : > { %v214_v13 = vmul.f32 %v397_v7, %v213_v11 }
  0x1b   : > { %v208_v12 = vadd.f32 %v207_v10, %v206_v8 }
  0x1c   : > { %v215_v15 = vadd.f32 %v397_v7, %v214_v13 }
  0x1d   : > { %v209_v14 = vrot.slane %v208_v12, 1 }
  0x1e   : > { %v217_v17 = vsel %vm216_vm1, %v397_v7, %v215_v15 }
  0x1f   : > { %v210_v16 = vadd.f32 %v209_v14, %v208_v12 }
  0x21   : > { %v218_v18 = vmul.f32 %v217_v17, %v210_v16 }
  0x23   : > { %v219_v19 = vsub.f32 %v202_v4, %v218_v18 }
  0x25   : > { %v220_v20 = vmul.f32 %v219_v19, %v219_v19 }
  0x27   : > { %v221_v21 = vsel %vm203_vm0, %v220_v20, 0.0 }
  0x28   : > { %v222_v22 = vrot.slane %v221_v21, 4 }
  0x2a   : > { %v223_v23 = vadd.f32 %v222_v22, %v221_v21 }
  0x2c   : > { %v224_v24 = vrot.slane %v223_v23, 2 }
  0x2e   : > { %v225_v25 = vadd.f32 %v224_v24, %v223_v23 }
  0x30   : > { %v226_v26 = vrot.slane %v225_v25, 1 }
  0x32   : > { %v227_v27 = vadd.f32 %v226_v26, %v225_v25 }
  0x34   : > { %v228_v28 = vmul.f32 %v227_v27, %v217_v17 }
  0x36   : > { %v229_v29 = vadd.f32 1e-06, %v228_v28 }
  0x38   : > { %398 = vrsqrt.f32 %v229_v29  ;;  %vm236_vm2 = vweird.f32 %v229_v29 }
  0x3e   : > { %v399_v30 = vpop.eup %398 }
  0x3f   : > { %v231_v31 = vmul.f32 %v399_v30, %v229_v29  ;;  %vm237_vm3 = vweird.f32 %v399_v30 }
  0x40   : > { %vm238_vm4 = vmor %vm236_vm2, %vm237_vm3 }
  0x41   : > { %v232_v32 = vmul.f32 %v399_v30, %v231_v31 }
  0x43   : > { %v233_v33 = vmul.f32 0.5, %v232_v32 }
  0x45   : > { %v234_v34 = vsub.f32 1.5, %v233_v33 }
  0x47   : > { %v235_v35 = vmul.f32 %v399_v30, %v234_v34 }
  0x49   : > { %v239_v37 = vsel %vm238_vm4, %v399_v30, %v235_v35 }
  0x4a   : > { %v241_v38 = vmul.f32 %v239_v37, %v219_v19 }
  0x82   : > { %v245_v36 = vpop.permute.xlu0 %244 }
  0x83   : > { %v247_v39 = vmul.f32 %v245_v36, %v241_v38 }
  0x8a   : > { %v252_v40 = vpop.permute.xlu0 %251 }
  0x8b   : > { %v254_v41 = vadd.f32 %v252_v40, %v247_v39 }
  0x8d   : > { %255 = vst [vmem:[%s201_s4] sm:$0xf] %v254_v41 }
  0x8e PF: > { %s13_s16 = sadd.s32 1, %s438_s16   ;;  %s532_s12 = smov %s430_s14 }
  0x8f   : > { %p10_p7 = scmp.ge.s32.totalorder %s13_s16, 6   ;;  %s533_s13 = smov %s434_s15 }
  0x90   : > { %s534_s14 = smov %s537_s17  ;;  %s535_s15 = smov %s541_s18 }
  0x91   :  { %12 = sbr.rel (!%p10_p7) target bundleno = 3 (0x3), region = 62 }

</bundles_post_ra>
